<compile_context>
chip_gen: v6e
topology: v6e:2x2x1
jax: 0.10.0
libtpu: 0.0.40
codegen_flags: <defaults>
</compile_context>

<pallas_src>
import jax
import jax.numpy as jnp
from jax import lax
from jax.experimental import pallas as pl
from jax.experimental.pallas import tpu as pltpu

BN_EPS = 1e-5
POSE_DIM = 7
SLAB_ROWS = 16  # 6 BN rows + 7 wp^T rows + 1 bias row + 2 pad rows (sublane multiple)


def pose_regressor_kernel(x_ref, w1_ref, w23_ref, p_ref, out_ref):
    B = x_ref.shape[0]
    inv_b = 1.0 / B

    p = p_ref[...]  # [16, dim] f32: rows 0-5 = g1,be1,g2,be2,g3,be3; 6-12 = wp^T; 13 = bp

    def bn_relu(y, g, be):
        # Single pass over y for both stats (independent reductions), then one
        # fused affine + ReLU traversal.
        s = jnp.sum(y, axis=0, keepdims=True)
        sq = jnp.sum(y * y, axis=0, keepdims=True)
        mean = s * inv_b
        var = jnp.maximum(sq * inv_b - mean * mean, 0.0)   # biased variance
        scale = g * lax.rsqrt(var + BN_EPS)                 # rsqrt -> EUP slot
        shift = be - mean * scale
        return jnp.maximum(y * scale + shift, 0.0)

    h = x_ref[...].astype(jnp.float32)

    # Layer 1: Linear (bias cancelled by training-mode BN) -> BN -> ReLU.
    # Weights arrive bf16 (half the HBM bytes); matmul math stays f32 here
    # since the activations are f32 at this batch size.
    y = jnp.dot(h, w1_ref[...].astype(jnp.float32), preferred_element_type=jnp.float32)
    h = bn_relu(y, p[0:1, :], p[1:2, :])

    # Layer 2
    y = jnp.dot(h, w23_ref[0].astype(jnp.float32), preferred_element_type=jnp.float32)
    h = bn_relu(y, p[2:3, :], p[3:4, :])

    # Layer 3
    y = jnp.dot(h, w23_ref[1].astype(jnp.float32), preferred_element_type=jnp.float32)
    h = bn_relu(y, p[4:5, :], p[5:6, :])

    # Pose head: wp packed transposed as slab rows 6..12 -> contract last dims.
    wp_t = p[6:6 + POSE_DIM, :]            # [7, dim]
    bp = p[13:14, 0:POSE_DIM]              # [1, 7]
    pose = lax.dot_general(h, wp_t, (((1,), (1,)), ((), ())),
                           preferred_element_type=jnp.float32) + bp
    out_ref[...] = pose.astype(out_ref.dtype)


def pose_regressor(x, params):
    """x: [B, input_c] float32. params: dict from init_params (packed slabs)."""
    B = x.shape[0]
    vmem = pl.BlockSpec(memory_space=pltpu.MemorySpace.VMEM)
    return pl.pallas_call(
        pose_regressor_kernel,
        out_shape=jax.ShapeDtypeStruct((B, POSE_DIM), jnp.float32),
        in_specs=[vmem] * 4,
        out_specs=vmem,
    )(x, params["w1_bf16"], params["w23_bf16"], params["p_slab"])


def init_params(key, input_c, dim):
    """PyTorch-style init. The large linear weights are rounded to bf16 (the values
    the kernel ships); the reference uses the same values in f32, so both paths
    compute the same module."""
    ks = jax.random.split(key, 12)

    def linear(kw, kb, fan_in, fan_out):
        bound = 1.0 / jnp.sqrt(fan_in)
        w = jax.random.uniform(kw, (fan_out, fan_in), jnp.float32, -bound, bound)
        b = jax.random.uniform(kb, (1, fan_out), jnp.float32, -bound, bound)
        return w.T, b  # [fan_in, fan_out], [1, fan_out]

    w1, b1 = linear(ks[0], ks[1], input_c, dim)
    w2, b2 = linear(ks[2], ks[3], dim, dim)
    w3, b3 = linear(ks[4], ks[5], dim, dim)
    wp, bp = linear(ks[6], ks[7], dim, POSE_DIM)

    # Make the big weights bf16-representable so kernel (bf16 storage) and
    # reference (f32 compute) see identical values.
    w1 = w1.astype(jnp.bfloat16).astype(jnp.float32)
    w2 = w2.astype(jnp.bfloat16).astype(jnp.float32)
    w3 = w3.astype(jnp.bfloat16).astype(jnp.float32)

    def bn_affine(kg, kb):
        g = 1.0 + 0.1 * jax.random.normal(kg, (1, dim), jnp.float32)
        be = 0.1 * jax.random.normal(kb, (1, dim), jnp.float32)
        return g, be

    g1, be1 = bn_affine(ks[8], ks[9])
    g2, be2 = bn_affine(ks[10], ks[11])
    g3, be3 = bn_affine(jax.random.fold_in(key, 100), jax.random.fold_in(key, 101))

    # Packed kernel slabs.
    w1_bf16 = w1.astype(jnp.bfloat16)                               # [input_c, dim]
    w23_bf16 = jnp.stack([w2, w3], axis=0).astype(jnp.bfloat16)     # [2, dim, dim]
    bp_row = jnp.zeros((1, dim), jnp.float32).at[:, :POSE_DIM].set(bp)
    pad = jnp.zeros((SLAB_ROWS - 6 - POSE_DIM - 1, dim), jnp.float32)
    p_slab = jnp.concatenate([g1, be1, g2, be2, g3, be3, wp.T, bp_row, pad], axis=0)
    assert p_slab.shape == (SLAB_ROWS, dim)

    return dict(
        # unpacked (reference / PyTorch semantics, WITH linear biases)
        w1=w1, b1=b1, g1=g1, be1=be1,
        w2=w2, b2=b2, g2=g2, be2=be2,
        w3=w3, b3=b3, g3=g3, be3=be3,
        wp=wp, bp=bp,
        # packed (kernel)
        w1_bf16=w1_bf16, w23_bf16=w23_bf16, p_slab=p_slab,
    )


def reference_forward(x, params):
    """Pure-JAX reference of the PyTorch forward (training-mode BN, WITH biases)."""
    def block(h, w, b, g, be):
        y = h @ w + b
        mean = jnp.mean(y, axis=0, keepdims=True)
        var = jnp.mean((y - mean) ** 2, axis=0, keepdims=True)
        y = (y - mean) / jnp.sqrt(var + BN_EPS)
        return jnp.maximum(y * g + be, 0.0)

    h = block(x, params["w1"], params["b1"], params["g1"], params["be1"])
    h = block(h, params["w2"], params["b2"], params["g2"], params["be2"])
    h = block(h, params["w3"], params["b3"], params["g3"], params["be3"])
    return h @ params["wp"] + params["bp"]


if __name__ == "__main__":
    key = jax.random.PRNGKey(0)
    kx, kp = jax.random.split(key)

    B, INPUT_C, DIM = 8, 16, 256  # module default dim=256 (MXU-aligned)
    x = jax.random.normal(kx, (B, INPUT_C), jnp.float32)
    params = init_params(kp, INPUT_C, DIM)

    pose = pose_regressor(x, params)
    pose = jax.block_until_ready(pose)

    ref = reference_forward(x, params)
    assert pose.shape == (B, POSE_DIM)
    assert jnp.allclose(pose, ref, atol=1e-4, rtol=1e-4), (
        f"mismatch: max abs err {jnp.max(jnp.abs(pose - ref))}"
    )
    print("KERNEL_OK")
</pallas_src>

<mosaic_0001>
module attributes {stable_mosaic.version = 11 : i64} {
  func.func @pose_regressor_kernel(%arg0: memref<8x16xf32, #tpu.memory_space<vmem>>, %arg1: memref<16x256xbf16, #tpu.memory_space<vmem>>, %arg2: memref<2x256x256xbf16, #tpu.memory_space<vmem>>, %arg3: memref<16x256xf32, #tpu.memory_space<vmem>>, %arg4: memref<8x7xf32, #tpu.memory_space<vmem>>) attributes {dimension_semantics = [], scalar_prefetch = 0 : i64, scratch_operands = 0 : i64, tpu.core_type = #tpu.core_type<tc>} {
    %c0 = arith.constant 0 : index
    %c0_0 = arith.constant 0 : index
    %0 = vector.load %arg3[%c0, %c0_0] : memref<16x256xf32, #tpu.memory_space<vmem>>, vector<16x256xf32>
    %c0_1 = arith.constant 0 : index
    %c0_2 = arith.constant 0 : index
    %1 = vector.load %arg0[%c0_1, %c0_2] : memref<8x16xf32, #tpu.memory_space<vmem>>, vector<8x16xf32>
    %c0_3 = arith.constant 0 : index
    %c0_4 = arith.constant 0 : index
    %2 = vector.load %arg1[%c0_3, %c0_4] : memref<16x256xbf16, #tpu.memory_space<vmem>>, vector<16x256xbf16>
    %3 = arith.extf %2 : vector<16x256xbf16> to vector<16x256xf32>
    %cst = arith.constant dense<0.000000e+00> : vector<8x256xf32>
    %4 = tpu.matmul %1, %3, %cst {dimension_numbers = #tpu.dot_dimension_numbers<[1], [0], [0], [1], [0, 0, 1, 1], [], []>} : vector<8x16xf32>, vector<16x256xf32>, vector<8x256xf32> -> vector<8x256xf32>
    %5 = vector.extract_strided_slice %0 {offsets = [0, 0], sizes = [1, 256], strides = [1, 1]} : vector<16x256xf32> to vector<1x256xf32>
    %6 = vector.extract_strided_slice %0 {offsets = [1, 0], sizes = [1, 256], strides = [1, 1]} : vector<16x256xf32> to vector<1x256xf32>
    %cst_5 = arith.constant dense<0.000000e+00> : vector<256xf32>
    %7 = vector.multi_reduction <add>, %4, %cst_5 [0] : vector<8x256xf32> to vector<256xf32>
    %8 = vector.shape_cast %7 : vector<256xf32> to vector<1x256xf32>
    %9 = arith.mulf %4, %4 : vector<8x256xf32>
    %cst_6 = arith.constant dense<0.000000e+00> : vector<256xf32>
    %10 = vector.multi_reduction <add>, %9, %cst_6 [0] : vector<8x256xf32> to vector<256xf32>
    %11 = vector.shape_cast %10 : vector<256xf32> to vector<1x256xf32>
    %cst_7 = arith.constant 1.250000e-01 : f32
    %12 = vector.broadcast %cst_7 : f32 to vector<1x256xf32>
    %13 = arith.mulf %8, %12 : vector<1x256xf32>
    %cst_8 = arith.constant 1.250000e-01 : f32
    %14 = vector.broadcast %cst_8 : f32 to vector<1x256xf32>
    %15 = arith.mulf %11, %14 : vector<1x256xf32>
    %16 = arith.mulf %13, %13 : vector<1x256xf32>
    %17 = arith.subf %15, %16 : vector<1x256xf32>
    %cst_9 = arith.constant 0.000000e+00 : f32
    %18 = vector.broadcast %cst_9 : f32 to vector<1x256xf32>
    %19 = arith.maximumf %17, %18 : vector<1x256xf32>
    %cst_10 = arith.constant 9.99999974E-6 : f32
    %20 = vector.broadcast %cst_10 : f32 to vector<1x256xf32>
    %21 = arith.addf %19, %20 : vector<1x256xf32>
    %22 = math.rsqrt %21 : vector<1x256xf32>
    %23 = arith.mulf %5, %22 : vector<1x256xf32>
    %24 = arith.mulf %13, %23 : vector<1x256xf32>
    %25 = arith.subf %6, %24 : vector<1x256xf32>
    %26 = vector.broadcast %23 : vector<1x256xf32> to vector<8x256xf32>
    %27 = arith.mulf %4, %26 : vector<8x256xf32>
    %28 = vector.broadcast %25 : vector<1x256xf32> to vector<8x256xf32>
    %29 = arith.addf %27, %28 : vector<8x256xf32>
    %cst_11 = arith.constant 0.000000e+00 : f32
    %30 = vector.broadcast %cst_11 : f32 to vector<8x256xf32>
    %31 = arith.maximumf %29, %30 : vector<8x256xf32>
    %c0_12 = arith.constant 0 : index
    %c0_13 = arith.constant 0 : index
    %c0_14 = arith.constant 0 : index
    %32 = vector.load %arg2[%c0_12, %c0_13, %c0_14] : memref<2x256x256xbf16, #tpu.memory_space<vmem>>, vector<1x256x256xbf16>
    %33 = vector.shape_cast %32 : vector<1x256x256xbf16> to vector<256x256xbf16>
    %34 = arith.extf %33 : vector<256x256xbf16> to vector<256x256xf32>
    %cst_15 = arith.constant dense<0.000000e+00> : vector<8x256xf32>
    %35 = tpu.matmul %31, %34, %cst_15 {dimension_numbers = #tpu.dot_dimension_numbers<[1], [0], [0], [1], [0, 0, 1, 1], [], []>} : vector<8x256xf32>, vector<256x256xf32>, vector<8x256xf32> -> vector<8x256xf32>
    %36 = vector.extract_strided_slice %0 {offsets = [2, 0], sizes = [1, 256], strides = [1, 1]} : vector<16x256xf32> to vector<1x256xf32>
    %37 = vector.extract_strided_slice %0 {offsets = [3, 0], sizes = [1, 256], strides = [1, 1]} : vector<16x256xf32> to vector<1x256xf32>
    %cst_16 = arith.constant dense<0.000000e+00> : vector<256xf32>
    %38 = vector.multi_reduction <add>, %35, %cst_16 [0] : vector<8x256xf32> to vector<256xf32>
    %39 = vector.shape_cast %38 : vector<256xf32> to vector<1x256xf32>
    %40 = arith.mulf %35, %35 : vector<8x256xf32>
    %cst_17 = arith.constant dense<0.000000e+00> : vector<256xf32>
    %41 = vector.multi_reduction <add>, %40, %cst_17 [0] : vector<8x256xf32> to vector<256xf32>
    %42 = vector.shape_cast %41 : vector<256xf32> to vector<1x256xf32>
    %cst_18 = arith.constant 1.250000e-01 : f32
    %43 = vector.broadcast %cst_18 : f32 to vector<1x256xf32>
    %44 = arith.mulf %39, %43 : vector<1x256xf32>
    %cst_19 = arith.constant 1.250000e-01 : f32
    %45 = vector.broadcast %cst_19 : f32 to vector<1x256xf32>
    %46 = arith.mulf %42, %45 : vector<1x256xf32>
    %47 = arith.mulf %44, %44 : vector<1x256xf32>
    %48 = arith.subf %46, %47 : vector<1x256xf32>
    %cst_20 = arith.constant 0.000000e+00 : f32
    %49 = vector.broadcast %cst_20 : f32 to vector<1x256xf32>
    %50 = arith.maximumf %48, %49 : vector<1x256xf32>
    %cst_21 = arith.constant 9.99999974E-6 : f32
    %51 = vector.broadcast %cst_21 : f32 to vector<1x256xf32>
    %52 = arith.addf %50, %51 : vector<1x256xf32>
    %53 = math.rsqrt %52 : vector<1x256xf32>
    %54 = arith.mulf %36, %53 : vector<1x256xf32>
    %55 = arith.mulf %44, %54 : vector<1x256xf32>
    %56 = arith.subf %37, %55 : vector<1x256xf32>
    %57 = vector.broadcast %54 : vector<1x256xf32> to vector<8x256xf32>
    %58 = arith.mulf %35, %57 : vector<8x256xf32>
    %59 = vector.broadcast %56 : vector<1x256xf32> to vector<8x256xf32>
    %60 = arith.addf %58, %59 : vector<8x256xf32>
    %cst_22 = arith.constant 0.000000e+00 : f32
    %61 = vector.broadcast %cst_22 : f32 to vector<8x256xf32>
    %62 = arith.maximumf %60, %61 : vector<8x256xf32>
    %c1 = arith.constant 1 : index
    %c0_23 = arith.constant 0 : index
    %c0_24 = arith.constant 0 : index
    %63 = vector.load %arg2[%c1, %c0_23, %c0_24] : memref<2x256x256xbf16, #tpu.memory_space<vmem>>, vector<1x256x256xbf16>
    %64 = vector.shape_cast %63 : vector<1x256x256xbf16> to vector<256x256xbf16>
    %65 = arith.extf %64 : vector<256x256xbf16> to vector<256x256xf32>
    %cst_25 = arith.constant dense<0.000000e+00> : vector<8x256xf32>
    %66 = tpu.matmul %62, %65, %cst_25 {dimension_numbers = #tpu.dot_dimension_numbers<[1], [0], [0], [1], [0, 0, 1, 1], [], []>} : vector<8x256xf32>, vector<256x256xf32>, vector<8x256xf32> -> vector<8x256xf32>
    %67 = vector.extract_strided_slice %0 {offsets = [4, 0], sizes = [1, 256], strides = [1, 1]} : vector<16x256xf32> to vector<1x256xf32>
    %68 = vector.extract_strided_slice %0 {offsets = [5, 0], sizes = [1, 256], strides = [1, 1]} : vector<16x256xf32> to vector<1x256xf32>
    %cst_26 = arith.constant dense<0.000000e+00> : vector<256xf32>
    %69 = vector.multi_reduction <add>, %66, %cst_26 [0] : vector<8x256xf32> to vector<256xf32>
    %70 = vector.shape_cast %69 : vector<256xf32> to vector<1x256xf32>
    %71 = arith.mulf %66, %66 : vector<8x256xf32>
    %cst_27 = arith.constant dense<0.000000e+00> : vector<256xf32>
    %72 = vector.multi_reduction <add>, %71, %cst_27 [0] : vector<8x256xf32> to vector<256xf32>
    %73 = vector.shape_cast %72 : vector<256xf32> to vector<1x256xf32>
    %cst_28 = arith.constant 1.250000e-01 : f32
    %74 = vector.broadcast %cst_28 : f32 to vector<1x256xf32>
    %75 = arith.mulf %70, %74 : vector<1x256xf32>
    %cst_29 = arith.constant 1.250000e-01 : f32
    %76 = vector.broadcast %cst_29 : f32 to vector<1x256xf32>
    %77 = arith.mulf %73, %76 : vector<1x256xf32>
    %78 = arith.mulf %75, %75 : vector<1x256xf32>
    %79 = arith.subf %77, %78 : vector<1x256xf32>
    %cst_30 = arith.constant 0.000000e+00 : f32
    %80 = vector.broadcast %cst_30 : f32 to vector<1x256xf32>
    %81 = arith.maximumf %79, %80 : vector<1x256xf32>
    %cst_31 = arith.constant 9.99999974E-6 : f32
    %82 = vector.broadcast %cst_31 : f32 to vector<1x256xf32>
    %83 = arith.addf %81, %82 : vector<1x256xf32>
    %84 = math.rsqrt %83 : vector<1x256xf32>
    %85 = arith.mulf %67, %84 : vector<1x256xf32>
    %86 = arith.mulf %75, %85 : vector<1x256xf32>
    %87 = arith.subf %68, %86 : vector<1x256xf32>
    %88 = vector.broadcast %85 : vector<1x256xf32> to vector<8x256xf32>
    %89 = arith.mulf %66, %88 : vector<8x256xf32>
    %90 = vector.broadcast %87 : vector<1x256xf32> to vector<8x256xf32>
    %91 = arith.addf %89, %90 : vector<8x256xf32>
    %cst_32 = arith.constant 0.000000e+00 : f32
    %92 = vector.broadcast %cst_32 : f32 to vector<8x256xf32>
    %93 = arith.maximumf %91, %92 : vector<8x256xf32>
    %94 = vector.extract_strided_slice %0 {offsets = [6, 0], sizes = [7, 256], strides = [1, 1]} : vector<16x256xf32> to vector<7x256xf32>
    %95 = vector.extract_strided_slice %0 {offsets = [13, 0], sizes = [1, 7], strides = [1, 1]} : vector<16x256xf32> to vector<1x7xf32>
    %cst_33 = arith.constant dense<0.000000e+00> : vector<8x7xf32>
    %96 = tpu.matmul %93, %94, %cst_33 {dimension_numbers = #tpu.dot_dimension_numbers<[1], [1], [0], [0], [0, 0, 1, 0], [], []>} : vector<8x256xf32>, vector<7x256xf32>, vector<8x7xf32> -> vector<8x7xf32>
    %97 = vector.broadcast %95 : vector<1x7xf32> to vector<8x7xf32>
    %98 = arith.addf %96, %97 : vector<8x7xf32>
    %c0_34 = arith.constant 0 : index
    %c0_35 = arith.constant 0 : index
    %99 = vector.load %arg4[%c0_34, %c0_35] : memref<8x7xf32, #tpu.memory_space<vmem>>, vector<8x7xf32>
    tpu.vector_store %arg4[%c0_34, %c0_35], %98 {strides = array<i32>} : memref<8x7xf32, #tpu.memory_space<vmem>>, vector<8x7xf32>,
    return
  }
}

</mosaic_0001>

<bundles_post_ra>
// kernel: tpu_custom_call.1
= control target key start
LH: loop header
LB: loop body
LE: loop exit
PB: predicated region body
PF: predicated region fallthrough
CT: control target
= control target key end

     0   :  { %9 = vsyncpa [#allocation3], 0  ;;  %s1031_s0 = inlined_call_operand.hbm [shape: f32[8,16], index: 0, kind: input, shape index: {}]   ;;  %s1032_s1 = inlined_call_operand.hbm [shape: bf16[16,256], index: 1, kind: input, shape index: {}]   ;;  %s1033_s2 = inlined_call_operand.hbm [shape: bf16[2,256,256], index: 2, kind: input, shape index: {}]   ;;  %s1034_s3 = inlined_call_operand.hbm [shape: f32[16,256], index: 3, kind: input, shape index: {}]   ;;  %s1035_s4 = inlined_call_operand.hbm [shape: f32[8,7], index: 4, kind: output, shape index: {}]  }
   0x1   :  { %10 = vsyncpa [#allocation6], 0 }
   0x2   :  { %11 = vsyncpa [#allocation9], 0 }
   0x3   :  { %12 = vsyncpa [#allocation4], 0  ;;  %s951_s15 = smov [#allocation5]  }
   0x4   :  { %s28_s16 = sshll.u32 %s951_s15, 4  ;;  %s29_s16 = int_to_ptr.vmem [resolvable:$true] %s28_s16 }
   0x5   :  { %s851_s17 = scalar_lea.vmem %s29_s16, 256  ;;  %p856_p1 = scmp.lt.s32.totalorder %s29_s16, %s29_s16 }
   0x6   :  { %p852_p0 = scmp.ne.s32.totalorder %s29_s16, %s851_s17  ;;  %p857_p2 = scmp.lt.s32.totalorder %s851_s17, %s851_s17 }
   0x8   :  { %p858_p3 = por %p857_p2, %p856_p1 }
   0xa   :  { %p859_p4 = pnand %p858_p3, %p852_p0 }
   0xc   :  { %862 = shalt.err (!%p859_p4)
}
   0xd   :  { %s952_s18 = smov 128   ;;  %s953_s19 = smov 8  }
   0xe   :  { %34 = dma.hbm_to_vmem [thread:$0]  %s1032_s1, 256, %s29_s16, [#allocation6], %s952_s18, %s952_s18, %s953_s19  }
   0xf   :  { %s954_s22 = smov [#allocation2]   ;;  %s955_s24 = smov [#allocation7]  }
  0x10   :  { %s19_s23 = sshll.u32 %s954_s22, 4  ;;  %s40_s25 = sshll.u32 %s955_s24, 4  ;;  %s20_s23 = int_to_ptr.vmem [resolvable:$true] %s19_s23  ;;  %s41_s25 = int_to_ptr.vmem [resolvable:$true] %s40_s25 }
  0x11   :  { %s871_s26 = scalar_lea.vmem %s20_s23, 128  ;;  %p876_p6 = scmp.lt.s32.totalorder %s20_s23, %s20_s23 }
  0x12   :  { %p872_p5 = scmp.ne.s32.totalorder %s20_s23, %s871_s26  ;;  %p877_p7 = scmp.lt.s32.totalorder %s871_s26, %s871_s26 }
  0x14   :  { %p878_p8 = por %p877_p7, %p876_p6 }
  0x16   :  { %p879_p9 = pnand %p878_p8, %p872_p5 }
  0x18   :  { %882 = shalt.err (!%p879_p9)
}
  0x19   :  { %22 = dma.hbm_to_vmem [thread:$0]  %s1031_s0, 128, %s20_s23, [#allocation3]  }
  0x1a   :  { %s891_s29 = scalar_lea.vmem %s41_s25, 8192  ;;  %p896_p11 = scmp.lt.s32.totalorder %s41_s25, %s41_s25 }
  0x1b   :  { %p892_p10 = scmp.ne.s32.totalorder %s41_s25, %s891_s29  ;;  %p897_p12 = scmp.lt.s32.totalorder %s891_s29, %s891_s29 }
  0x1d   :  { %p898_p13 = por %p897_p12, %p896_p11 }
  0x1f   :  { %p899_p0 = pnand %p898_p13, %p892_p10 }
  0x21   :  { %902 = shalt.err (!%p899_p0)
}
  0x22   :  { %46 = dma.hbm_to_vmem [thread:$0]  %s1033_s2, 8192, %s41_s25, [#allocation6], %s952_s18, %s952_s18, %s953_s19  }
  0x23   :  { %s956_s5 = smov [#allocation8]  }
  0x24   :  { %s52_s6 = sshll.u32 %s956_s5, 4  ;;  %s53_s6 = int_to_ptr.vmem [resolvable:$true] %s52_s6 }
  0x25   :  { %s911_s7 = scalar_lea.vmem %s53_s6, 512  ;;  %p916_p2 = scmp.lt.s32.totalorder %s53_s6, %s53_s6 }
  0x26   :  { %p912_p1 = scmp.ne.s32.totalorder %s53_s6, %s911_s7  ;;  %p917_p3 = scmp.lt.s32.totalorder %s911_s7, %s911_s7 }
  0x28   :  { %p918_p4 = por %p917_p3, %p916_p2 }
  0x2a   :  { %p919_p5 = pnand %p918_p4, %p912_p1 }
  0x2c   :  { %922 = shalt.err (!%p919_p5)
}
  0x2d   :  { %s957_s0 = smov 256   ;;  %s958_s8 = smov 16  }
  0x2e   :  { %58 = dma.hbm_to_vmem [thread:$0]  %s1034_s3, 512, %s53_s6, [#allocation9], %s957_s0, %s957_s0, %s958_s8  }
  0x2f   :  { %943 = dma.done.wait [#allocation3], 128  }
  0x30   :  { %944 = vsyncadd [#allocation3], 4294967168 }
  0x31   :  { %945 = dma.done.wait [#allocation6], 8448  }
  0x32   :  { %946 = vsyncadd [#allocation6], 4294958848 }
  0x33   :  { %947 = dma.done.wait [#allocation9], 512  }
  0x34   :  { %948 = vsyncadd [#allocation9], 4294966784  ;;  %v959_v0 = vmov 0.0   ;;  %v77_v1 = vld [vmem:[#allocation5 + $0x8] sm:$0xff]  ;;  %v76_v2 = vld [vmem:[#allocation5] sm:$0xff]  ;;  %vm82_vm0 = vcmask 130048  }
  0x35   :  { %150 = vmatprep.mubr.f32.mxu0 %v959_v0  ;;  %v81_v3 = vunpack.c.h.bf16 %v77_v1  ;;  %v80_v4 = vunpack.c.l.bf16 %v77_v1  ;;  %v79_v5 = vunpack.c.h.bf16 %v76_v2  ;;  %v246_v6 = vld [vmem:[#allocation7 + $0x78] sm:$0xff]  ;;  %v245_v7 = vld [vmem:[#allocation7 + $0x70] sm:$0xff]  ;;  %v244_v8 = vld [vmem:[#allocation7 + $0x68] sm:$0xff]  ;;  %v78_v9 = vunpack.c.l.bf16 %v76_v2  ;;  %s960_s2 = smov [#allocation10]  }
  0x36   :  { %v294_v10 = vunpack.c.h.bf16 %v246_v6  ;;  %v293_v11 = vunpack.c.l.bf16 %v246_v6  ;;  %v292_v12 = vunpack.c.h.bf16 %v245_v7  ;;  %v291_v13 = vunpack.c.l.bf16 %v245_v7  ;;  %v243_v14 = vld [vmem:[#allocation7 + $0x60] sm:$0xff]  ;;  %v75_v15 = vld [vmem:[#allocation2] sm:$0xff]  ;;  %v242_v18 = vld [vmem:[#allocation7 + $0x58] sm:$0xff]  ;;  %s809_s3 = sshll.u32 %s960_s2, 4  ;;  %s810_s3 = int_to_ptr.vmem [resolvable:$true] %s809_s3 }
  0x37   :  { %114 = vmatprep.subr.mxu0 %v81_v3  ;;  %v290_v16 = vunpack.c.h.bf16 %v244_v8  ;;  %v289_v17 = vunpack.c.l.bf16 %v244_v8  ;;  %v288_v19 = vunpack.c.h.bf16 %v243_v14  ;;  %v287_v20 = vunpack.c.l.bf16 %v243_v14  ;;  %v241_v23 = vld [vmem:[#allocation7 + $0x50] sm:$0xff]  ;;  %v240_v26 = vld [vmem:[#allocation7 + $0x48] sm:$0xff]  ;;  %v239_v29 = vld [vmem:[#allocation7 + $0x40] sm:$0xff]  ;;  %s923_s11 = scalar_lea.vmem %s810_s3, 128  ;;  %p928_p7 = scmp.lt.s32.totalorder %s810_s3, %s810_s3 }
  0x38   :  { %115 = vmatpush1.msra.mxu0 %v80_v4  ;;  %327 = vmatprep.subr.mxu1 %v294_v10  ;;  %v286_v21 = vunpack.c.h.bf16 %v242_v18  ;;  %v285_v22 = vunpack.c.l.bf16 %v242_v18  ;;  %v284_v24 = vunpack.c.h.bf16 %v241_v23  ;;  %v283_v25 = vunpack.c.l.bf16 %v241_v23  ;;  %v238_v32 = vld [vmem:[#allocation7 + $0x38] sm:$0xff]  ;;  %v237_v35 = vld [vmem:[#allocation7 + $0x30] sm:$0xff]  ;;  %v236_v38 = vld [vmem:[#allocation7 + $0x28] sm:$0xff]  ;;  %p924_p6 = scmp.ne.s32.totalorder %s810_s3, %s923_s11  ;;  %p929_p8 = scmp.lt.s32.totalorder %s923_s11, %s923_s11 }
  0x39   :  { %116 = vmatprep.subr.mxu0 %v79_v5  ;;  %328 = vmatpush1.msra.mxu1 %v293_v11  ;;  %v282_v27 = vunpack.c.h.bf16 %v240_v26  ;;  %v281_v28 = vunpack.c.l.bf16 %v240_v26  ;;  %v280_v30 = vunpack.c.h.bf16 %v239_v29  ;;  %v279_v31 = vunpack.c.l.bf16 %v239_v29  ;;  %v235_v41 = vld [vmem:[#allocation7 + $0x20] sm:$0xff]  ;;  %v234_v44 = vld [vmem:[#allocation7 + $0x18] sm:$0xff]  ;;  %v233_v47 = vld [vmem:[#allocation7 + $0x10] sm:$0xff] }
  0x3a   :  { %117 = vmatpush1.msra.mxu0 %v78_v9  ;;  %329 = vmatprep.subr.mxu1 %v292_v12  ;;  %v278_v33 = vunpack.c.h.bf16 %v238_v32  ;;  %v277_v34 = vunpack.c.l.bf16 %v238_v32  ;;  %v276_v36 = vunpack.c.h.bf16 %v237_v35  ;;  %v275_v37 = vunpack.c.l.bf16 %v237_v35  ;;  %v232_v50 = vld [vmem:[#allocation7 + $0x8] sm:$0xff]  ;;  %v231_v53 = vld [vmem:[#allocation7] sm:$0xff]  ;;  %v262_v56 = vld [vmem:[#allocation7 + $0xf8] sm:$0xff]  ;;  %p930_p9 = por %p929_p8, %p928_p7 }
  0x3b   :  { %820 = vmatmul.mubr.msk.f32.vlgmr.msra.gmra.mxu0 %vm82_vm0, %v75_v15  ;;  %330 = vmatpush1.msra.mxu1 %v291_v13  ;;  %v274_v39 = vunpack.c.h.bf16 %v236_v38  ;;  %v273_v40 = vunpack.c.l.bf16 %v236_v38  ;;  %v272_v42 = vunpack.c.h.bf16 %v235_v41  ;;  %v271_v43 = vunpack.c.l.bf16 %v235_v41  ;;  %v261_v59 = vld [vmem:[#allocation7 + $0xf0] sm:$0xff]  ;;  %v260_v62 = vld [vmem:[#allocation7 + $0xe8] sm:$0xff]  ;;  %v259_v1 = vld [vmem:[#allocation7 + $0xe0] sm:$0xff] }
  0x3c   :  { %331 = vmatprep.subr.mxu1 %v290_v16  ;;  %v270_v45 = vunpack.c.h.bf16 %v234_v44  ;;  %v269_v46 = vunpack.c.l.bf16 %v234_v44  ;;  %v268_v48 = vunpack.c.h.bf16 %v233_v47  ;;  %v267_v49 = vunpack.c.l.bf16 %v233_v47  ;;  %v258_v4 = vld [vmem:[#allocation7 + $0xd8] sm:$0xff]  ;;  %v257_v7 = vld [vmem:[#allocation7 + $0xd0] sm:$0xff]  ;;  %v256_v10 = vld [vmem:[#allocation7 + $0xc8] sm:$0xff]  ;;  %p931_p10 = pnand %p930_p9, %p924_p6 }
  0x3d   :  { %332 = vmatpush1.msra.mxu1 %v289_v17  ;;  %v266_v51 = vunpack.c.h.bf16 %v232_v50  ;;  %v265_v52 = vunpack.c.l.bf16 %v232_v50  ;;  %v264_v54 = vunpack.c.h.bf16 %v231_v53  ;;  %v263_v55 = vunpack.c.l.bf16 %v231_v53  ;;  %v255_v13 = vld [vmem:[#allocation7 + $0xc0] sm:$0xff]  ;;  %v254_v16 = vld [vmem:[#allocation7 + $0xb8] sm:$0xff]  ;;  %v248_v32 = vld [vmem:[#allocation7 + $0x88] sm:$0xff] }
  0x3e   :  { %333 = vmatprep.subr.mxu1 %v288_v19  ;;  %v326_v57 = vunpack.c.h.bf16 %v262_v56  ;;  %v325_v58 = vunpack.c.l.bf16 %v262_v56  ;;  %v324_v60 = vunpack.c.h.bf16 %v261_v59  ;;  %v323_v61 = vunpack.c.l.bf16 %v261_v59  ;;  %v253_v19 = vld [vmem:[#allocation7 + $0xb0] sm:$0xff]  ;;  %v250_v26 = vld [vmem:[#allocation7 + $0x98] sm:$0xff]  ;;  %v247_v35 = vld [vmem:[#allocation7 + $0x80] sm:$0xff] }
  0x3f   :  { %334 = vmatpush1.msra.mxu1 %v287_v20  ;;  %v322_v63 = vunpack.c.h.bf16 %v260_v62  ;;  %v321_v0 = vunpack.c.l.bf16 %v260_v62  ;;  %v320_v2 = vunpack.c.h.bf16 %v259_v1  ;;  %v319_v3 = vunpack.c.l.bf16 %v259_v1  ;;  %v487_v41 = vld [vmem:[#allocation7 + $0x170] sm:$0xff]  ;;  %v485_v47 = vld [vmem:[#allocation7 + $0x160] sm:$0xff]  ;;  %v484_v50 = vld [vmem:[#allocation7 + $0x158] sm:$0xff] }
  0x40   :  { %335 = vmatprep.subr.mxu1 %v286_v21  ;;  %v318_v5 = vunpack.c.h.bf16 %v258_v4  ;;  %v317_v6 = vunpack.c.l.bf16 %v258_v4  ;;  %v316_v8 = vunpack.c.h.bf16 %v257_v7  ;;  %v315_v9 = vunpack.c.l.bf16 %v257_v7 }
  0x41   :  { %336 = vmatpush1.msra.mxu1 %v285_v22  ;;  %v314_v11 = vunpack.c.h.bf16 %v256_v10  ;;  %v313_v12 = vunpack.c.l.bf16 %v256_v10  ;;  %v312_v14 = vunpack.c.h.bf16 %v255_v13  ;;  %v311_v15 = vunpack.c.l.bf16 %v255_v13  ;;  %v252_v22 = vld [vmem:[#allocation7 + $0xa8] sm:$0xff] }
  0x42   :  { %337 = vmatprep.subr.mxu1 %v284_v24  ;;  %v310_v17 = vunpack.c.h.bf16 %v254_v16  ;;  %v309_v18 = vunpack.c.l.bf16 %v254_v16  ;;  %v308_v20 = vunpack.c.h.bf16 %v253_v19  ;;  %v307_v21 = vunpack.c.l.bf16 %v253_v19 }
  0x43   :  { %338 = vmatpush1.msra.mxu1 %v283_v25  ;;  %v306_v23 = vunpack.c.h.bf16 %v252_v22  ;;  %v305_v24 = vunpack.c.l.bf16 %v252_v22  ;;  %v251_v25 = vld [vmem:[#allocation7 + $0xa0] sm:$0xff]  ;;  %v296_v38 = vunpack.c.h.bf16 %v247_v35  ;;  %v528_v53 = vunpack.c.h.bf16 %v484_v50 }
  0x44   :  { %339 = vmatprep.subr.mxu1 %v282_v27  ;;  %v249_v27 = vld [vmem:[#allocation7 + $0x90] sm:$0xff]  ;;  %v303_v29 = vunpack.c.l.bf16 %v251_v25  ;;  %vm722_vm1 = vcmask 1041408   ;;  %vm801_vm2 = vcmask 56320  }
  0x45   :  { %340 = vmatpush1.msra.mxu1 %v281_v28  ;;  %v304_v28 = vunpack.c.h.bf16 %v251_v25 }
  0x46   :  { %341 = vmatprep.subr.mxu1 %v280_v30  ;;  %v302_v30 = vunpack.c.h.bf16 %v250_v26 }
  0x47   :  { %342 = vmatpush1.msra.mxu1 %v279_v31  ;;  %v301_v31 = vunpack.c.l.bf16 %v250_v26 }
  0x48   :  { %343 = vmatprep.subr.mxu1 %v278_v33  ;;  %v300_v33 = vunpack.c.h.bf16 %v249_v27 }
  0x49   :  { %344 = vmatpush1.msra.mxu1 %v277_v34  ;;  %v299_v34 = vunpack.c.l.bf16 %v249_v27 }
  0x4a   :  { %345 = vmatprep.subr.mxu1 %v276_v36  ;;  %v298_v36 = vunpack.c.h.bf16 %v248_v32 }
  0x4b   :  { %346 = vmatpush1.msra.mxu1 %v275_v37  ;;  %v297_v37 = vunpack.c.l.bf16 %v248_v32  ;;  %v998_v32 = vld [vmem:[#allocation8] sm:$0xff] }
  0x4c   :  { %347 = vmatprep.subr.mxu1 %v274_v39  ;;  %v295_v39 = vunpack.c.l.bf16 %v247_v35  ;;  %v1002_v35 = vld [vmem:[#allocation8 + $0x8] sm:$0xff] }
  0x4d   :  { %348 = vmatpush1.msra.mxu1 %v273_v40  ;;  %v488_v40 = vld [vmem:[#allocation7 + $0x178] sm:$0xff] }
  0x4e   :  { %349 = vmatprep.subr.mxu1 %v272_v42  ;;  %v486_v42 = vld [vmem:[#allocation7 + $0x168] sm:$0xff]  ;;  %v536_v44 = vunpack.c.h.bf16 %v488_v40 }
  0x4f   :  { %350 = vmatpush1.msra.mxu1 %v271_v43  ;;  %v535_v43 = vunpack.c.l.bf16 %v488_v40 }
  0x50   :  { %351 = vmatprep.subr.mxu1 %v270_v45  ;;  %v534_v45 = vunpack.c.h.bf16 %v487_v41  ;;  %569 = vmatprep.subr.mxu0 %v536_v44 }
  0x51   :  { %352 = vmatpush1.msra.mxu1 %v269_v46  ;;  %v533_v46 = vunpack.c.l.bf16 %v487_v41  ;;  %570 = vmatpush1.msra.mxu0 %v535_v43 }
  0x52   :  { %353 = vmatprep.subr.mxu1 %v268_v48  ;;  %v532_v48 = vunpack.c.h.bf16 %v486_v42  ;;  %571 = vmatprep.subr.mxu0 %v534_v45 }
  0x53   :  { %354 = vmatpush1.msra.mxu1 %v267_v49  ;;  %v531_v49 = vunpack.c.l.bf16 %v486_v42  ;;  %572 = vmatpush1.msra.mxu0 %v533_v46 }
  0x54   :  { %355 = vmatprep.subr.mxu1 %v266_v51  ;;  %v530_v51 = vunpack.c.h.bf16 %v485_v47  ;;  %573 = vmatprep.subr.mxu0 %v532_v48 }
  0x55   :  { %356 = vmatpush1.msra.mxu1 %v265_v52  ;;  %v529_v52 = vunpack.c.l.bf16 %v485_v47  ;;  %574 = vmatpush1.msra.mxu0 %v531_v49 }
  0x56   :  { %357 = vmatprep.subr.mxu1 %v264_v54  ;;  %v527_v54 = vunpack.c.l.bf16 %v484_v50  ;;  %575 = vmatprep.subr.mxu0 %v530_v51 }
  0x57   :  { %358 = vmatpush1.msra.mxu1 %v263_v55  ;;  %576 = vmatpush1.msra.mxu0 %v529_v52 }
  0x58   :  { %359 = vmatprep.subr.mxu1 %v326_v57  ;;  %577 = vmatprep.subr.mxu0 %v528_v53 }
  0x59   :  { %360 = vmatpush2.msra.mxu1 %v325_v58  ;;  %578 = vmatpush1.msra.mxu0 %v527_v54 }
  0x5a   :  { %361 = vmatprep.subr.mxu1 %v324_v60 }
  0x5b   :  { %362 = vmatpush2.msra.mxu1 %v323_v61 }
  0x5c   :  { %363 = vmatprep.subr.mxu1 %v322_v63 }
  0x5d   :  { %364 = vmatpush2.msra.mxu1 %v321_v0 }
  0x5e   :  { %365 = vmatprep.subr.mxu1 %v320_v2 }
  0x5f   :  { %366 = vmatpush2.msra.mxu1 %v319_v3 }
  0x60   :  { %367 = vmatprep.subr.mxu1 %v318_v5 }
  0x61   :  { %368 = vmatpush2.msra.mxu1 %v317_v6 }
  0x62   :  { %369 = vmatprep.subr.mxu1 %v316_v8 }
  0x63   :  { %370 = vmatpush2.msra.mxu1 %v315_v9 }
  0x64   :  { %371 = vmatprep.subr.mxu1 %v314_v11 }
  0x65   :  { %372 = vmatpush2.msra.mxu1 %v313_v12 }
  0x66   :  { %373 = vmatprep.subr.mxu1 %v312_v14 }
  0x67   :  { %374 = vmatpush2.msra.mxu1 %v311_v15 }
  0x68   :  { %375 = vmatprep.subr.mxu1 %v310_v17 }
  0x69   :  { %376 = vmatpush2.msra.mxu1 %v309_v18 }
  0x6a   :  { %377 = vmatprep.subr.mxu1 %v308_v20 }
  0x6b   :  { %378 = vmatpush2.msra.mxu1 %v307_v21 }
  0x6c   :  { %379 = vmatprep.subr.mxu1 %v306_v23 }
  0x6d   :  { %380 = vmatpush2.msra.mxu1 %v305_v24 }
  0x6e   :  { %381 = vmatprep.subr.mxu1 %v304_v28 }
  0x6f   :  { %382 = vmatpush2.msra.mxu1 %v303_v29 }
  0x70   :  { %383 = vmatprep.subr.mxu1 %v302_v30 }
  0x71   :  { %384 = vmatpush2.msra.mxu1 %v301_v31  ;;  %v209_v31 = vlaneseq }
  0x72   :  { %385 = vmatprep.subr.mxu1 %v300_v33 }
  0x73   :  { %386 = vmatpush2.msra.mxu1 %v299_v34  ;;  %v1000_v33 = vshrl.u32 %v209_v31, 7 }
  0x74   :  { %387 = vmatprep.subr.mxu1 %v298_v36 }
  0x75   :  { %388 = vmatpush2.msra.mxu1 %v297_v37  ;;  %v221_v42 = vsub.s32 1, %v1000_v33 }
  0x76   :  { %389 = vmatprep.subr.mxu1 %v296_v38  ;;  %v211_v38 = vsub.s32 0, %v1000_v33 }
  0x77   :  { %390 = vmatpush2.msra.mxu1 %v295_v39 }
  0xfb   :  { %v152_v55 = vpop.f32.mrf.mxu0 }
  0xfc   :  { %v157_v56 = vrot.slane %v152_v55, 4  ;;  %v169_v57 = vmul.f32 %v152_v55, %v152_v55 }
  0xfd   :  { %v154_v58 = vpop.f32.mrf.mxu0 }
  0xfe   :  { %v158_v59 = vadd.f32 %v157_v56, %v152_v55  ;;  %v171_v60 = vrot.slane %v169_v57, 4  ;;  %v163_v61 = vrot.slane %v154_v58, 4  ;;  %v170_v62 = vmul.f32 %v154_v58, %v154_v58 }
 0x100   :  { %v159_v63 = vrot.slane %v158_v59, 2  ;;  %v172_v0 = vadd.f32 %v171_v60, %v169_v57  ;;  %v164_v1 = vadd.f32 %v163_v61, %v154_v58  ;;  %v177_v2 = vrot.slane %v170_v62, 4 }
 0x102   :  { %v160_v3 = vadd.f32 %v159_v63, %v158_v59  ;;  %v173_v4 = vrot.slane %v172_v0, 2  ;;  %v165_v5 = vrot.slane %v164_v1, 2  ;;  %v178_v6 = vadd.f32 %v177_v2, %v170_v62  ;;  %v483_v59 = vld [vmem:[#allocation7 + $0x150] sm:$0xff]  ;;  %v482_v62 = vld [vmem:[#allocation7 + $0x148] sm:$0xff] }
 0x103   :  { %v526_v60 = vunpack.c.h.bf16 %v483_v59  ;;  %v525_v61 = vunpack.c.l.bf16 %v483_v59  ;;  %v524_v63 = vunpack.c.h.bf16 %v482_v62 }
 0x104   :  { %v161_v7 = vrot.slane %v160_v3, 1  ;;  %v174_v8 = vadd.f32 %v173_v4, %v172_v0  ;;  %v166_v9 = vadd.f32 %v165_v5, %v164_v1  ;;  %v179_v10 = vrot.slane %v178_v6, 2  ;;  %v481_v1 = vld [vmem:[#allocation7 + $0x140] sm:$0xff]  ;;  %v479_v5 = vld [vmem:[#allocation7 + $0x130] sm:$0xff] }
 0x105   :  { %579 = vmatprep.subr.mxu0 %v526_v60  ;;  %v523_v0 = vunpack.c.l.bf16 %v482_v62  ;;  %v522_v2 = vunpack.c.h.bf16 %v481_v1 }
 0x106   :  { %v162_v11 = vadd.f32 %v161_v7, %v160_v3  ;;  %v175_v12 = vrot.slane %v174_v8, 1  ;;  %v167_v13 = vrot.slane %v166_v9, 1  ;;  %v180_v14 = vadd.f32 %v179_v10, %v178_v6  ;;  %580 = vmatpush1.msra.mxu0 %v525_v61  ;;  %v494_v61 = vld [vmem:[#allocation7 + $0x1a8] sm:$0xff] }
 0x107   :  { %581 = vmatprep.subr.mxu0 %v524_v63  ;;  %v518_v6 = vunpack.c.h.bf16 %v479_v5  ;;  %v517_v7 = vunpack.c.l.bf16 %v479_v5  ;;  %v548_v62 = vunpack.c.h.bf16 %v494_v61  ;;  %v547_v63 = vunpack.c.l.bf16 %v494_v61 }
 0x108   :  { %v176_v15 = vadd.f32 %v175_v12, %v174_v8  ;;  %v183_v16 = vmul.f32 0.125, %v162_v11  ;;  %v181_v17 = vrot.slane %v180_v14, 1  ;;  %v168_v18 = vadd.f32 %v167_v13, %v166_v9  ;;  %582 = vmatpush1.msra.mxu0 %v523_v0  ;;  %v478_v8 = vld [vmem:[#allocation7 + $0x128] sm:$0xff]  ;;  %v477_v11 = vld [vmem:[#allocation7 + $0x120] sm:$0xff] }
 0x109   :  { %583 = vmatprep.subr.mxu0 %v522_v2  ;;  %v516_v9 = vunpack.c.h.bf16 %v478_v8  ;;  %v515_v10 = vunpack.c.l.bf16 %v478_v8  ;;  %v514_v12 = vunpack.c.h.bf16 %v477_v11  ;;  %v513_v13 = vunpack.c.l.bf16 %v477_v11  ;;  %v493_v0 = vld [vmem:[#allocation7 + $0x1a0] sm:$0xff] }
 0x10a   :  { %v185_v19 = vmul.f32 0.125, %v176_v15  ;;  %v187_v20 = vmul.f32 %v183_v16, %v183_v16  ;;  %v182_v21 = vadd.f32 %v181_v17, %v180_v14  ;;  %v184_v22 = vmul.f32 0.125, %v168_v18  ;;  %v476_v14 = vld [vmem:[#allocation7 + $0x118] sm:$0xff]  ;;  %v475_v17 = vld [vmem:[#allocation7 + $0x110] sm:$0xff]  ;;  %v489_v8 = vld [vmem:[#allocation7 + $0x180] sm:$0xff] }
 0x10b   :  { %v512_v15 = vunpack.c.h.bf16 %v476_v14  ;;  %v510_v18 = vunpack.c.h.bf16 %v475_v17  ;;  %v545_v2 = vunpack.c.l.bf16 %v493_v0  ;;  %v538_v11 = vunpack.c.h.bf16 %v489_v8 }
 0x10c   :  { %v189_v23 = vsub.f32 %v185_v19, %v187_v20  ;;  %v186_v24 = vmul.f32 0.125, %v182_v21  ;;  %v188_v25 = vmul.f32 %v184_v22, %v184_v22  ;;  %v509_v19 = vunpack.c.l.bf16 %v475_v17  ;;  %v474_v20 = vld [vmem:[#allocation7 + $0x108] sm:$0xff] }
 0x10d   :  { %v508_v21 = vunpack.c.h.bf16 %v474_v20  ;;  %v452_v61 = vsub.s32 2, %v1000_v33 }
 0x10e   :  { %v191_v26 = vmax.f32 %v189_v23, 0.0  ;;  %v190_v27 = vsub.f32 %v186_v24, %v188_v25  ;;  %v473_v23 = vld [vmem:[#allocation7 + $0x100] sm:$0xff] }
 0x10f   :  { %v506_v24 = vunpack.c.h.bf16 %v473_v23  ;;  %v505_v25 = vunpack.c.l.bf16 %v473_v23 }
 0x110   :  { %v193_v28 = vadd.f32 1e-05, %v191_v26  ;;  %v192_v29 = vmax.f32 %v190_v27, 0.0  ;;  %v504_v26 = vld [vmem:[#allocation7 + $0x1f8] sm:$0xff] }
 0x111   :  { %v568_v27 = vunpack.c.h.bf16 %v504_v26 }
 0x112   :  { %831 = vrsqrt.f32 %v193_v28  ;;  %v194_v30 = vadd.f32 1e-05, %v192_v29  ;;  %v567_v28 = vunpack.c.l.bf16 %v504_v26  ;;  %v503_v29 = vld [vmem:[#allocation7 + $0x1f0] sm:$0xff] }
 0x113   :  { %v565_v31 = vunpack.c.l.bf16 %v503_v29 }
 0x114   :  { %833 = vrsqrt.f32 %v194_v30  ;;  %v566_v30 = vunpack.c.h.bf16 %v503_v29 }
 0x11f   :  { %v832_v34 = vpop.eup %831 }
 0x120   :  { %v197_v36 = vmul.f32 %v832_v34, %v998_v32  ;;  %v502_v34 = vld [vmem:[#allocation7 + $0x1e8] sm:$0xff] }
 0x121   :  { %v834_v37 = vpop.eup %833 }
 0x122   :  { %v198_v39 = vmul.f32 %v834_v37, %v1002_v35  ;;  %v199_v40 = vmul.f32 %v197_v36, %v183_v16  ;;  %v212_v44 = vrot.slane %v197_v36, %v211_v38  ;;  %v511_v16 = vunpack.c.l.bf16 %v476_v14 }
 0x123   :  { %v564_v36 = vunpack.c.h.bf16 %v502_v34  ;;  %v563_v37 = vunpack.c.l.bf16 %v502_v34 }
 0x124   :  { %v200_v41 = vmul.f32 %v198_v39, %v184_v22  ;;  %v203_v43 = vrot.slane %v199_v40, 7  ;;  %v216_v46 = vrot.slane %v198_v39, %v211_v38  ;;  %v217_v50 = vmul.f32 %v212_v44, %v152_v55  ;;  %v501_v38 = vld [vmem:[#allocation7 + $0x1e0] sm:$0xff]  ;;  %v499_v44 = vld [vmem:[#allocation7 + $0x1d0] sm:$0xff] }
 0x125   :  { %v521_v55 = vunpack.c.l.bf16 %v481_v1  ;;  %v507_v22 = vunpack.c.l.bf16 %v474_v20  ;;  %v562_v39 = vunpack.c.h.bf16 %v501_v38  ;;  %v561_v40 = vunpack.c.l.bf16 %v501_v38 }
 0x126   :  { %v204_v45 = vrot.slane %v200_v41, 7  ;;  %v207_v47 = vsub.f32 %v998_v32, %v203_v43  ;;  %v218_v51 = vmul.f32 %v216_v46, %v154_v58  ;;  %v480_v58 = vld [vmem:[#allocation7 + $0x138] sm:$0xff]  ;;  %v557_v46 = vunpack.c.l.bf16 %v499_v44 }
 0x127   :  { %v520_v3 = vunpack.c.h.bf16 %v480_v58  ;;  %584 = vmatpush1.msra.mxu0 %v521_v55  ;;  %v519_v4 = vunpack.c.l.bf16 %v480_v58  ;;  %v500_v41 = vld [vmem:[#allocation7 + $0x1d8] sm:$0xff]  ;;  %v546_v1 = vunpack.c.h.bf16 %v493_v0 }
 0x128   :  { %v208_v48 = vsub.f32 %v1002_v35, %v204_v45  ;;  %v222_v49 = vrot.slane %v207_v47, %v221_v42  ;;  %v559_v43 = vunpack.c.l.bf16 %v500_v41  ;;  %v558_v45 = vunpack.c.h.bf16 %v499_v44  ;;  %v498_v47 = vld [vmem:[#allocation7 + $0x1c8] sm:$0xff]  ;;  %v492_v55 = vld [vmem:[#allocation7 + $0x198] sm:$0xff] }
 0x129   :  { %585 = vmatprep.subr.mxu0 %v520_v3  ;;  %v544_v58 = vunpack.c.h.bf16 %v492_v55  ;;  %v543_v3 = vunpack.c.l.bf16 %v492_v55 }
 0x12a   :  { %v226_v52 = vrot.slane %v208_v48, %v221_v42  ;;  %v227_v53 = vadd.f32 %v222_v49, %v217_v50  ;;  %586 = vmatpush1.msra.mxu0 %v519_v4  ;;  %v560_v42 = vunpack.c.h.bf16 %v500_v41  ;;  %v556_v48 = vunpack.c.h.bf16 %v498_v47  ;;  %v497_v50 = vld [vmem:[#allocation7 + $0x1c0] sm:$0xff]  ;;  %v491_v4 = vld [vmem:[#allocation7 + $0x190] sm:$0xff] }
 0x12b   :  { %587 = vmatprep.subr.mxu0 %v518_v6  ;;  %v555_v49 = vunpack.c.l.bf16 %v498_v47  ;;  %v542_v5 = vunpack.c.h.bf16 %v491_v4  ;;  %v541_v6 = vunpack.c.l.bf16 %v491_v4 }
 0x12c   :  { %v228_v54 = vadd.f32 %v226_v52, %v218_v51  ;;  %v229_v57 = vmax.f32 %v227_v53, 0.0  ;;  %588 = vmatpush1.msra.mxu0 %v517_v7  ;;  %v554_v51 = vunpack.c.h.bf16 %v497_v50  ;;  %v553_v52 = vunpack.c.l.bf16 %v497_v50  ;;  %v496_v53 = vld [vmem:[#allocation7 + $0x1b8] sm:$0xff]  ;;  %v490_v7 = vld [vmem:[#allocation7 + $0x188] sm:$0xff] }
 0x12d   :  { %589 = vmatprep.subr.mxu0 %v516_v9  ;;  %v539_v9 = vunpack.c.l.bf16 %v490_v7 }
 0x12e   :  { %v230_v56 = vmax.f32 %v228_v54, 0.0  ;;  %590 = vmatpush1.msra.mxu0 %v515_v10  ;;  %v552_v54 = vunpack.c.h.bf16 %v496_v53  ;;  %v540_v10 = vunpack.c.h.bf16 %v490_v7 }
 0x12f   :  { %591 = vmatprep.subr.mxu0 %v514_v12  ;;  %v537_v12 = vunpack.c.l.bf16 %v489_v8 }
 0x130   :  { %391 = vmatprep.mubr.f32.mxu1 %v230_v56  ;;  %592 = vmatpush1.msra.mxu0 %v513_v13  ;;  %v551_v56 = vunpack.c.l.bf16 %v496_v53 }
 0x131   :  { %392 = vmatmul.mubr.f32.vlgmr.msra.gmra.mxu1 %v229_v57  ;;  %593 = vmatprep.subr.mxu0 %v512_v15  ;;  %v495_v57 = vld [vmem:[#allocation7 + $0x1b0] sm:$0xff] }
 0x132   :  { %594 = vmatpush1.msra.mxu0 %v511_v16  ;;  %v550_v59 = vunpack.c.h.bf16 %v495_v57  ;;  %v549_v60 = vunpack.c.l.bf16 %v495_v57 }
 0x133   :  { %595 = vmatprep.subr.mxu0 %v510_v18 }
 0x134   :  { %596 = vmatpush1.msra.mxu0 %v509_v19 }
 0x135   :  { %597 = vmatprep.subr.mxu0 %v508_v21 }
 0x136   :  { %598 = vmatpush1.msra.mxu0 %v507_v22 }
 0x137   :  { %599 = vmatprep.subr.mxu0 %v506_v24 }
 0x138   :  { %600 = vmatpush1.msra.mxu0 %v505_v25 }
 0x139   :  { %601 = vmatprep.subr.mxu0 %v568_v27 }
 0x13a   :  { %602 = vmatpush2.msra.mxu0 %v567_v28 }
 0x13b   :  { %603 = vmatprep.subr.mxu0 %v566_v30 }
 0x13c   :  { %604 = vmatpush2.msra.mxu0 %v565_v31 }
 0x13d   :  { %605 = vmatprep.subr.mxu0 %v564_v36 }
 0x13e   :  { %606 = vmatpush2.msra.mxu0 %v563_v37 }
 0x13f   :  { %607 = vmatprep.subr.mxu0 %v562_v39 }
 0x140   :  { %608 = vmatpush2.msra.mxu0 %v561_v40 }
 0x141   :  { %609 = vmatprep.subr.mxu0 %v560_v42 }
 0x142   :  { %610 = vmatpush2.msra.mxu0 %v559_v43 }
 0x143   :  { %611 = vmatprep.subr.mxu0 %v558_v45 }
 0x144   :  { %612 = vmatpush2.msra.mxu0 %v557_v46 }
 0x145   :  { %613 = vmatprep.subr.mxu0 %v556_v48 }
 0x146   :  { %614 = vmatpush2.msra.mxu0 %v555_v49 }
 0x147   :  { %615 = vmatprep.subr.mxu0 %v554_v51 }
 0x148   :  { %616 = vmatpush2.msra.mxu0 %v553_v52 }
 0x149   :  { %617 = vmatprep.subr.mxu0 %v552_v54 }
 0x14a   :  { %618 = vmatpush2.msra.mxu0 %v551_v56 }
 0x14b   :  { %619 = vmatprep.subr.mxu0 %v550_v59 }
 0x14c   :  { %620 = vmatpush2.msra.mxu0 %v549_v60 }
 0x14d   :  { %621 = vmatprep.subr.mxu0 %v548_v62 }
 0x14e   :  { %622 = vmatpush2.msra.mxu0 %v547_v63 }
 0x14f   :  { %623 = vmatprep.subr.mxu0 %v546_v1  ;;  %v462_v1 = vsub.s32 3, %v1000_v33 }
 0x150   :  { %624 = vmatpush2.msra.mxu0 %v545_v2 }
 0x151   :  { %625 = vmatprep.subr.mxu0 %v544_v58 }
 0x152   :  { %626 = vmatpush2.msra.mxu0 %v543_v3 }
 0x153   :  { %627 = vmatprep.subr.mxu0 %v542_v5 }
 0x154   :  { %628 = vmatpush2.msra.mxu0 %v541_v6 }
 0x155   :  { %629 = vmatprep.subr.mxu0 %v540_v10 }
 0x156   :  { %630 = vmatpush2.msra.mxu0 %v539_v9 }
 0x157   :  { %631 = vmatprep.subr.mxu0 %v538_v11 }
 0x158   :  { %632 = vmatpush2.msra.mxu0 %v537_v12 }
 0x1f1   :  { %v393_v13 = vpop.f32.mrf.mxu1 }
 0x1f2   :  { %v398_v14 = vrot.slane %v393_v13, 4  ;;  %v410_v15 = vmul.f32 %v393_v13, %v393_v13 }
 0x1f3   :  { %v395_v16 = vpop.f32.mrf.mxu1 }
 0x1f4   :  { %v399_v17 = vadd.f32 %v398_v14, %v393_v13  ;;  %v412_v18 = vrot.slane %v410_v15, 4  ;;  %v404_v19 = vrot.slane %v395_v16, 4  ;;  %v411_v20 = vmul.f32 %v395_v16, %v395_v16 }
 0x1f6   :  { %v400_v21 = vrot.slane %v399_v17, 2  ;;  %v413_v22 = vadd.f32 %v412_v18, %v410_v15  ;;  %v405_v23 = vadd.f32 %v404_v19, %v395_v16  ;;  %v418_v24 = vrot.slane %v411_v20, 4  ;;  %v74_v15 = vld [vmem:[#allocation8 + $0x18] sm:$0xff]  ;;  %v1017_v19 = vld [vmem:[#allocation8 + $0x10] sm:$0xff] }
 0x1f7   :  { %v727_v18 = vrot.slane %v74_v15, 6 }
 0x1f8   :  { %v401_v25 = vadd.f32 %v400_v21, %v399_v17  ;;  %v414_v26 = vrot.slane %v413_v22, 2  ;;  %v406_v27 = vrot.slane %v405_v23, 2  ;;  %v419_v28 = vadd.f32 %v418_v24, %v411_v20 }
 0x1f9   :  { %v726_v17 = vrot.slane %v1002_v35, 6  ;;  %v723_v20 = vrot.slane %v998_v32, 6  ;;  %v724_v21 = vrot.slane %v1017_v19, 6 }
 0x1fa   :  { %v402_v29 = vrot.slane %v401_v25, 1  ;;  %v415_v30 = vadd.f32 %v414_v26, %v413_v22  ;;  %v407_v31 = vadd.f32 %v406_v27, %v405_v23  ;;  %v420_v34 = vrot.slane %v419_v28, 2 }
 0x1fc   :  { %v403_v36 = vadd.f32 %v402_v29, %v401_v25  ;;  %v416_v37 = vrot.slane %v415_v30, 1  ;;  %v408_v38 = vrot.slane %v407_v31, 1  ;;  %v421_v39 = vadd.f32 %v420_v34, %v419_v28 }
 0x1fe   :  { %v417_v40 = vadd.f32 %v416_v37, %v415_v30  ;;  %v424_v41 = vmul.f32 0.125, %v403_v36  ;;  %v409_v42 = vadd.f32 %v408_v38, %v407_v31  ;;  %v422_v43 = vrot.slane %v421_v39, 1 }
 0x200   :  { %v426_v44 = vmul.f32 0.125, %v417_v40  ;;  %v428_v45 = vmul.f32 %v424_v41, %v424_v41  ;;  %v423_v46 = vadd.f32 %v422_v43, %v421_v39  ;;  %v425_v47 = vmul.f32 0.125, %v409_v42 }
 0x202   :  { %v430_v48 = vsub.f32 %v426_v44, %v428_v45  ;;  %v427_v49 = vmul.f32 0.125, %v423_v46  ;;  %v429_v50 = vmul.f32 %v425_v47, %v425_v47 }
 0x204   :  { %v432_v51 = vmax.f32 %v430_v48, 0.0  ;;  %v431_v52 = vsub.f32 %v427_v49, %v429_v50 }
 0x206   :  { %v434_v53 = vadd.f32 1e-05, %v432_v51  ;;  %v433_v54 = vmax.f32 %v431_v52, 0.0 }
 0x208   :  { %835 = vrsqrt.f32 %v434_v53  ;;  %v435_v56 = vadd.f32 1e-05, %v433_v54 }
 0x20a   :  { %837 = vrsqrt.f32 %v435_v56 }
 0x215   :  { %v836_v57 = vpop.eup %835 }
 0x216   :  { %v438_v59 = vmul.f32 %v836_v57, %v998_v32 }
 0x217   :  { %v838_v60 = vpop.eup %837 }
 0x218   :  { %v440_v62 = vmul.f32 %v438_v59, %v424_v41  ;;  %v439_v63 = vmul.f32 %v838_v60, %v1002_v35  ;;  %v453_v55 = vrot.slane %v438_v59, %v452_v61 }
 0x21a   :  { %v444_v0 = vrot.slane %v440_v62, 7  ;;  %v441_v2 = vmul.f32 %v439_v63, %v425_v47  ;;  %v457_v3 = vrot.slane %v439_v63, %v452_v61  ;;  %v458_v7 = vmul.f32 %v453_v55, %v393_v13 }
 0x21b   :  { %v728_v13 = vsel %vm722_vm1, %v726_v17, %v727_v18 }
 0x21c   :  { %v448_v58 = vsub.f32 %v998_v32, %v444_v0  ;;  %v445_v4 = vrot.slane %v441_v2, 7  ;;  %v459_v8 = vmul.f32 %v457_v3, %v395_v16  ;;  %761 = vmatprep.subr.mxu1 %v728_v13  ;;  %v725_v16 = vsel %vm722_vm1, %v723_v20, %v724_v21 }
 0x21d   :  { %762 = vmatpush1.xpose.msra.mxu1 %v725_v16 }
 0x21e   :  { %v463_v5 = vrot.slane %v448_v58, %v462_v1  ;;  %v449_v6 = vsub.f32 %v1002_v35, %v445_v4  ;;  %v694_v4 = vsub.s32 4, %v1000_v33 }
 0x220   :  { %v467_v9 = vrot.slane %v449_v6, %v462_v1  ;;  %v468_v10 = vadd.f32 %v463_v5, %v458_v7 }
 0x222   :  { %v469_v11 = vadd.f32 %v467_v9, %v459_v8  ;;  %v470_v14 = vmax.f32 %v468_v10, 0.0  ;;  %v704_v8 = vsub.s32 5, %v1000_v33 }
 0x224   :  { %v471_v12 = vmax.f32 %v469_v11, 0.0  ;;  %v717_v33 = vrot.slane %v1017_v19, %v704_v8 }
 0x226   :  { %633 = vmatprep.mubr.f32.mxu0 %v471_v12 }
 0x227   :  { %634 = vmatmul.mubr.f32.vlgmr.msra.gmra.mxu0 %v470_v14 }
 0x2e7   :  { %v635_v22 = vpop.f32.mrf.mxu0 }
 0x2e8   :  { %v640_v23 = vrot.slane %v635_v22, 4  ;;  %v652_v24 = vmul.f32 %v635_v22, %v635_v22 }
 0x2e9   :  { %v637_v25 = vpop.f32.mrf.mxu0 }
 0x2ea   :  { %v641_v26 = vadd.f32 %v640_v23, %v635_v22  ;;  %v654_v27 = vrot.slane %v652_v24, 4  ;;  %v646_v28 = vrot.slane %v637_v25, 4  ;;  %v653_v29 = vmul.f32 %v637_v25, %v637_v25 }
 0x2ec   :  { %v642_v30 = vrot.slane %v641_v26, 2  ;;  %v655_v31 = vadd.f32 %v654_v27, %v652_v24  ;;  %v647_v34 = vadd.f32 %v646_v28, %v637_v25  ;;  %v660_v36 = vrot.slane %v653_v29, 4 }
 0x2ee   :  { %v643_v37 = vadd.f32 %v642_v30, %v641_v26  ;;  %v656_v38 = vrot.slane %v655_v31, 2  ;;  %v648_v39 = vrot.slane %v647_v34, 2  ;;  %v661_v40 = vadd.f32 %v660_v36, %v653_v29 }
 0x2f0   :  { %v644_v41 = vrot.slane %v643_v37, 1  ;;  %v657_v42 = vadd.f32 %v656_v38, %v655_v31  ;;  %v649_v43 = vadd.f32 %v648_v39, %v647_v34  ;;  %v662_v44 = vrot.slane %v661_v40, 2 }
 0x2f2   :  { %v645_v45 = vadd.f32 %v644_v41, %v643_v37  ;;  %v658_v46 = vrot.slane %v657_v42, 1  ;;  %v650_v47 = vrot.slane %v649_v43, 1  ;;  %v663_v48 = vadd.f32 %v662_v44, %v661_v40 }
 0x2f4   :  { %v659_v49 = vadd.f32 %v658_v46, %v657_v42  ;;  %v666_v50 = vmul.f32 0.125, %v645_v45  ;;  %v651_v51 = vadd.f32 %v650_v47, %v649_v43  ;;  %v664_v52 = vrot.slane %v663_v48, 1 }
 0x2f6   :  { %v668_v53 = vmul.f32 0.125, %v659_v49  ;;  %v670_v54 = vmul.f32 %v666_v50, %v666_v50  ;;  %v665_v56 = vadd.f32 %v664_v52, %v663_v48  ;;  %v667_v57 = vmul.f32 0.125, %v651_v51 }
 0x2f8   :  { %v672_v59 = vsub.f32 %v668_v53, %v670_v54  ;;  %v669_v60 = vmul.f32 0.125, %v665_v56  ;;  %v671_v61 = vmul.f32 %v667_v57, %v667_v57 }
 0x2fa   :  { %v674_v62 = vmax.f32 %v672_v59, 0.0  ;;  %v673_v63 = vsub.f32 %v669_v60, %v671_v61 }
 0x2fc   :  { %v676_v0 = vadd.f32 1e-05, %v674_v62  ;;  %v675_v1 = vmax.f32 %v673_v63, 0.0 }
 0x2fe   :  { %839 = vrsqrt.f32 %v676_v0  ;;  %v677_v2 = vadd.f32 1e-05, %v675_v1 }
 0x300   :  { %841 = vrsqrt.f32 %v677_v2 }
 0x30b   :  { %v840_v55 = vpop.eup %839 }
 0x30c   :  { %v680_v58 = vmul.f32 %v840_v55, %v998_v32 }
 0x30d   :  { %v842_v3 = vpop.eup %841 }
 0x30e   :  { %v682_v5 = vmul.f32 %v680_v58, %v666_v50  ;;  %v681_v6 = vmul.f32 %v842_v3, %v1002_v35  ;;  %v695_v10 = vrot.slane %v680_v58, %v694_v4 }
 0x310   :  { %v686_v7 = vrot.slane %v682_v5, 7  ;;  %v683_v9 = vmul.f32 %v681_v6, %v667_v57  ;;  %v699_v14 = vrot.slane %v681_v6, %v694_v4  ;;  %v700_v18 = vmul.f32 %v695_v10, %v635_v22 }
 0x312   :  { %v690_v11 = vsub.f32 %v998_v32, %v686_v7  ;;  %v687_v12 = vrot.slane %v683_v9, 7  ;;  %v701_v20 = vmul.f32 %v699_v14, %v637_v25 }
 0x314   :  { %v705_v15 = vrot.slane %v690_v11, %v704_v8  ;;  %v691_v17 = vsub.f32 %v1002_v35, %v687_v12 }
 0x316   :  { %v709_v21 = vrot.slane %v691_v17, %v704_v8  ;;  %v710_v13 = vadd.f32 %v705_v15, %v700_v18 }
 0x318   :  { %v711_v16 = vadd.f32 %v709_v21, %v701_v20  ;;  %v712_v24 = vmax.f32 %v710_v13, 0.0 }
 0x31a   :  { %v713_v23 = vmax.f32 %v711_v16, 0.0 }
 0x31c   :  { %795 = vmatprep.mubr.f32.mxu1 %v713_v23 }
 0x31d   :  { %796 = vmatmul.mubr.f32.vlgmr.msra.gmra.mxu1 %v712_v24 }
 0x3dd   :  { %v797_v26 = vpop.f32.mrf.mxu1 }
 0x3de   :  { %v798_v32 = vadd.f32 %v797_v26, %v717_v33 }
 0x3df   :  { %v799_v27 = vpop.f32.mrf.mxu1 }
 0x3e0   :  { %802 = vst.msk [vmem:[#allocation10] sm:$0xff] %vm801_vm2, %v798_v32 }
 0x3e1   :  { %934 = shalt.err (!%p931_p10)
}
 0x3e2   :  { %812 = dma.vmem_to_hbm [thread:$0]  %s810_s3, 128, %s1035_s4, [#allocation4]  }
 0x3e3   :  { %949 = dma.done.wait [#allocation4], 128  }
 0x3e4   :  { %950 = vsyncadd [#allocation4], 4294967168 }
 0x3e5   :  { %816 = vsyncpa [#allocation3], 1 }
 0x3e6   :  { %817 = vsyncpa [#allocation6], 1 }
 0x3e7   :  { %818 = vsyncpa [#allocation9], 1 }
 0x3e8   :  { %819 = vsyncpa [#allocation4], 1 }

</bundles_post_ra>
